<compile_context>
chip_gen: v7x
topology: tpu7x:2x2x1
jax: 0.10.0
libtpu: 0.0.40
codegen_flags: <defaults>
</compile_context>

<pallas_src>
import functools
import math

import jax
import jax.numpy as jnp
from jax import lax
from jax.experimental import pallas as pl
from jax.experimental.pallas import tpu as pltpu

LN_EPS = 1e-12
_INV_SQRT2 = 1.0 / math.sqrt(2.0)


def _round_up(x, m):
    return ((x + m - 1) // m) * m


def _mlm_head_kernel(x_ref, wd_ref, bd_ref, g_ref, be_ref, e_ref, db_ref,
                     o_ref, t_ref):
    # x_ref : (TM, H)   row tile of sequence_output
    # wd_ref: (H, H)    transform dense weight, PyTorch (out, in) layout
    # bd_ref: (1, H)    transform dense bias
    # g_ref : (1, H)    LayerNorm gamma
    # be_ref: (1, H)    LayerNorm beta
    # e_ref : (TV, H)   decoder (tied embedding) weight tile, (vocab, hidden)
    # db_ref: (1, TV)   decoder bias tile
    # o_ref : (TM, TV)  output tile of prediction scores
    # t_ref : (TM, H)   VMEM scratch: transformed rows, persists across vocab steps
    j = pl.program_id(1)

    @pl.when(j == 0)
    def _transform():
        # Dense: contract x's last dim against W's last dim ((out, in) layout),
        # so no W.T is ever materialized.  Operands keep their input dtype
        # (bf16 in production); accumulation is f32 on the MXU.
        h = lax.dot_general(
            x_ref[...], wd_ref[...],
            dimension_numbers=(((1,), (1,)), ((), ())),
            preferred_element_type=jnp.float32)
        h = h + bd_ref[...].astype(jnp.float32)
        # Exact (erf-based) gelu, matching the reference PyTorch module.
        h = h * 0.5 * (1.0 + lax.erf(h * _INV_SQRT2))
        # LayerNorm over the hidden dim (biased variance, eps=1e-12), f32 math.
        mean = jnp.mean(h, axis=-1, keepdims=True)
        c = h - mean
        var = jnp.mean(c * c, axis=-1, keepdims=True)
        hn = c * lax.rsqrt(var + LN_EPS)
        hn = hn * g_ref[...].astype(jnp.float32) + be_ref[...].astype(jnp.float32)
        t_ref[...] = hn.astype(t_ref.dtype)

    # Decoder: scores tile = t @ E_j.T + b_j  (contract last dims again).
    s = lax.dot_general(
        t_ref[...], e_ref[...],
        dimension_numbers=(((1,), (1,)), ((), ())),
        preferred_element_type=jnp.float32)
    s = s + db_ref[...].astype(jnp.float32)
    o_ref[...] = s.astype(o_ref.dtype)


@functools.partial(jax.jit, static_argnames=("block_rows", "block_vocab"))
def bert_only_mlm_head(sequence_output, dense_w, dense_b, ln_gamma, ln_beta,
                       decoder_w, decoder_b, *, block_rows=256, block_vocab=512):
    """sequence_output: [B,S,H]; dense_w: [H,H] (out,in); decoder_w: [V,H]; decoder_b: [V]."""
    B, S, H = sequence_output.shape
    V, H2 = decoder_w.shape
    assert H2 == H
    rows = B * S

    x = sequence_output.reshape(rows, H)

    # Row tiling: clamp to the (padded) row count; always a multiple of 8.
    tm = min(block_rows, _round_up(rows, 8))
    rows_p = _round_up(rows, tm)
    # Vocab tiling: multiple of 128 so output stores are lane-dense.
    tv = min(block_vocab, _round_up(V, 128))
    v_p = _round_up(V, tv)

    if rows_p != rows:
        x = jnp.pad(x, ((0, rows_p - rows), (0, 0)))
    e = decoder_w
    db = decoder_b
    if v_p != V:
        e = jnp.pad(e, ((0, v_p - V), (0, 0)))
        db = jnp.pad(db, ((0, v_p - V),))

    bd2 = dense_b.reshape(1, H)
    g2 = ln_gamma.reshape(1, H)
    be2 = ln_beta.reshape(1, H)
    db2 = db.reshape(1, v_p)

    grid = (rows_p // tm, v_p // tv)

    itemsize = jnp.dtype(sequence_output.dtype).itemsize
    cost = pl.CostEstimate(
        flops=2 * rows_p * H * H + 2 * rows_p * H * v_p,
        transcendentals=rows_p * H + rows_p,  # gelu(erf) + rsqrt
        bytes_accessed=(rows_p * H + H * H + 3 * H + v_p * H + v_p
                        + rows_p * v_p) * itemsize)

    out = pl.pallas_call(
        _mlm_head_kernel,
        out_shape=jax.ShapeDtypeStruct((rows_p, v_p), sequence_output.dtype),
        grid_spec=pltpu.PrefetchScalarGridSpec(
            num_scalar_prefetch=0,
            grid=grid,
            in_specs=[
                pl.BlockSpec((tm, H), lambda i, j: (i, 0)),   # activation rows
                # Constant index_map -> Pallas fetches these once and keeps them
                # resident across all grid steps.  (pipeline_mode=pl.Buffered(1)
                # would reclaim the second buffer, but total VMEM use is <10 MiB
                # at production sizes, well under v7x's 64 MiB.)
                pl.BlockSpec((H, H), lambda i, j: (0, 0)),    # dense W (out, in)
                pl.BlockSpec((1, H), lambda i, j: (0, 0)),    # dense bias
                pl.BlockSpec((1, H), lambda i, j: (0, 0)),    # LN gamma
                pl.BlockSpec((1, H), lambda i, j: (0, 0)),    # LN beta
                pl.BlockSpec((tv, H), lambda i, j: (j, 0)),   # decoder W tile
                pl.BlockSpec((1, tv), lambda i, j: (0, j)),   # decoder bias tile
            ],
            out_specs=pl.BlockSpec((tm, tv), lambda i, j: (i, j)),
            scratch_shapes=[pltpu.VMEM((tm, H), sequence_output.dtype)],
        ),
        compiler_params=pltpu.CompilerParams(
            dimension_semantics=("parallel", "arbitrary"),
            vmem_limit_bytes=48 * 1024 * 1024,
        ),
        cost_estimate=cost,
    )(x, dense_w, bd2, g2, be2, e, db2)

    return out[:rows, :V].reshape(B, S, V)


def _reference(sequence_output, dense_w, dense_b, ln_gamma, ln_beta,
               decoder_w, decoder_b):
    h = jnp.einsum("bsh,oh->bso", sequence_output, dense_w) + dense_b
    h = h * 0.5 * (1.0 + lax.erf(h * _INV_SQRT2))
    mean = jnp.mean(h, axis=-1, keepdims=True)
    var = jnp.mean((h - mean) ** 2, axis=-1, keepdims=True)
    hn = (h - mean) / jnp.sqrt(var + LN_EPS) * ln_gamma + ln_beta
    return jnp.einsum("bsh,vh->bsv", hn, decoder_w) + decoder_b


if __name__ == "__main__":
    key = jax.random.PRNGKey(0)
    B, S, H, V = 2, 8, 32, 64  # batch, seq, hidden_size, vocab (tied-embedding rows)

    k1, k2, k3, k4, k5 = jax.random.split(key, 5)
    sequence_output = jax.random.normal(k1, (B, S, H), dtype=jnp.float32)

    # Deterministic synthetic parameters (not a checkpoint).
    dense_w = jax.random.normal(k2, (H, H), dtype=jnp.float32) * 0.02    # Linear weight (out, in)
    dense_b = jax.random.normal(k3, (H,), dtype=jnp.float32) * 0.02      # Linear bias
    ln_gamma = jnp.ones((H,), dtype=jnp.float32)                         # BertLayerNorm weight
    ln_beta = jnp.zeros((H,), dtype=jnp.float32)                         # BertLayerNorm bias
    decoder_w = jax.random.normal(k4, (V, H), dtype=jnp.float32) * 0.02  # tied embedding (vocab, hidden)
    decoder_b = jax.random.normal(k5, (V,), dtype=jnp.float32) * 0.02    # BertLMPredictionHead.bias

    out = bert_only_mlm_head(sequence_output, dense_w, dense_b, ln_gamma, ln_beta,
                             decoder_w, decoder_b)
    out = jax.block_until_ready(out)

    ref = _reference(sequence_output, dense_w, dense_b, ln_gamma, ln_beta,
                     decoder_w, decoder_b)
    assert out.shape == (B, S, V)
    assert jnp.allclose(out, ref, atol=1e-4, rtol=1e-4), "mismatch vs reference"

    print("KERNEL_OK")
</pallas_src>

<mosaic_0001>
module attributes {stable_mosaic.version = 11 : i64} {
  func.func @_mlm_head_kernel(%arg0: i32, %arg1: i32, %arg2: memref<16x32xf32, #tpu.memory_space<vmem>>, %arg3: memref<32x32xf32, #tpu.memory_space<vmem>>, %arg4: memref<1x32xf32, #tpu.memory_space<vmem>>, %arg5: memref<1x32xf32, #tpu.memory_space<vmem>>, %arg6: memref<1x32xf32, #tpu.memory_space<vmem>>, %arg7: memref<128x32xf32, #tpu.memory_space<vmem>>, %arg8: memref<1x128xf32, #tpu.memory_space<vmem>>, %arg9: memref<16x128xf32, #tpu.memory_space<vmem>>, %arg10: memref<16x32xf32, #tpu.memory_space<vmem>>) attributes {dimension_semantics = [#tpu.dimension_semantics<parallel>, #tpu.dimension_semantics<arbitrary>], iteration_bounds = array<i64: 1, 1>, scalar_prefetch = 0 : i64, scratch_operands = 1 : i64, tpu.core_type = #tpu.core_type<tc>, window_params = [{transform_indices = @transform_0, window_bounds = array<i64: 16, 32>}, {pipeline_mode = #tpu.pipeline_mode<synchronous>, transform_indices = @transform_1, window_bounds = array<i64: 32, 32>}, {pipeline_mode = #tpu.pipeline_mode<synchronous>, transform_indices = @transform_2, window_bounds = array<i64: 1, 32>}, {pipeline_mode = #tpu.pipeline_mode<synchronous>, transform_indices = @transform_3, window_bounds = array<i64: 1, 32>}, {pipeline_mode = #tpu.pipeline_mode<synchronous>, transform_indices = @transform_4, window_bounds = array<i64: 1, 32>}, {transform_indices = @transform_5, window_bounds = array<i64: 128, 32>}, {transform_indices = @transform_6, window_bounds = array<i64: 1, 128>}, {transform_indices = @transform_7, window_bounds = array<i64: 16, 128>}]} {
    %c0_i32 = arith.constant 0 : i32
    %0 = arith.cmpi eq, %arg1, %c0_i32 : i32
    %1 = arith.extui %0 : i1 to i32
    %c0_i32_0 = arith.constant 0 : i32
    %2 = arith.cmpi ne, %1, %c0_i32_0 : i32
    scf.if %2 {
      %c0_8 = arith.constant 0 : index
      %c0_9 = arith.constant 0 : index
      %10 = vector.load %arg2[%c0_8, %c0_9] : memref<16x32xf32, #tpu.memory_space<vmem>>, vector<16x32xf32>
      %c0_10 = arith.constant 0 : index
      %c0_11 = arith.constant 0 : index
      %11 = vector.load %arg3[%c0_10, %c0_11] : memref<32x32xf32, #tpu.memory_space<vmem>>, vector<32x32xf32>
      %cst_12 = arith.constant dense<0.000000e+00> : vector<16x32xf32>
      %12 = tpu.matmul %10, %11, %cst_12 {dimension_numbers = #tpu.dot_dimension_numbers<[1], [1], [0], [0], [0, 0, 1, 0], [], []>} : vector<16x32xf32>, vector<32x32xf32>, vector<16x32xf32> -> vector<16x32xf32>
      %c0_13 = arith.constant 0 : index
      %c0_14 = arith.constant 0 : index
      %13 = vector.load %arg4[%c0_13, %c0_14] : memref<1x32xf32, #tpu.memory_space<vmem>>, vector<1x32xf32>
      %14 = vector.broadcast %13 : vector<1x32xf32> to vector<16x32xf32>
      %15 = arith.addf %12, %14 : vector<16x32xf32>
      %cst_15 = arith.constant 5.000000e-01 : f32
      %16 = vector.broadcast %cst_15 : f32 to vector<16x32xf32>
      %17 = arith.mulf %15, %16 : vector<16x32xf32>
      %cst_16 = arith.constant 0.707106769 : f32
      %18 = vector.broadcast %cst_16 : f32 to vector<16x32xf32>
      %19 = arith.mulf %15, %18 : vector<16x32xf32>
      %20 = math.erf %19 : vector<16x32xf32>
      %cst_17 = arith.constant 1.000000e+00 : f32
      %21 = vector.broadcast %cst_17 : f32 to vector<16x32xf32>
      %22 = arith.addf %21, %20 : vector<16x32xf32>
      %23 = arith.mulf %17, %22 : vector<16x32xf32>
      %cst_18 = arith.constant dense<0.000000e+00> : vector<16xf32>
      %24 = vector.multi_reduction <add>, %23, %cst_18 [1] : vector<16x32xf32> to vector<16xf32>
      %25 = vector.shape_cast %24 : vector<16xf32> to vector<16x1xf32>
      %cst_19 = arith.constant 3.200000e+01 : f32
      %26 = vector.broadcast %cst_19 : f32 to vector<16x1xf32>
      %27 = arith.divf %25, %26 : vector<16x1xf32>
      %28 = vector.broadcast %27 : vector<16x1xf32> to vector<16x32xf32>
      %29 = arith.subf %23, %28 : vector<16x32xf32>
      %30 = arith.mulf %29, %29 : vector<16x32xf32>
      %cst_20 = arith.constant dense<0.000000e+00> : vector<16xf32>
      %31 = vector.multi_reduction <add>, %30, %cst_20 [1] : vector<16x32xf32> to vector<16xf32>
      %32 = vector.shape_cast %31 : vector<16xf32> to vector<16x1xf32>
      %cst_21 = arith.constant 3.200000e+01 : f32
      %33 = vector.broadcast %cst_21 : f32 to vector<16x1xf32>
      %34 = arith.divf %32, %33 : vector<16x1xf32>
      %cst_22 = arith.constant 9.99999996E-13 : f32
      %35 = vector.broadcast %cst_22 : f32 to vector<16x1xf32>
      %36 = arith.addf %34, %35 : vector<16x1xf32>
      %37 = math.rsqrt %36 : vector<16x1xf32>
      %38 = vector.broadcast %37 : vector<16x1xf32> to vector<16x32xf32>
      %39 = arith.mulf %29, %38 : vector<16x32xf32>
      %c0_23 = arith.constant 0 : index
      %c0_24 = arith.constant 0 : index
      %40 = vector.load %arg5[%c0_23, %c0_24] : memref<1x32xf32, #tpu.memory_space<vmem>>, vector<1x32xf32>
      %41 = vector.broadcast %40 : vector<1x32xf32> to vector<16x32xf32>
      %42 = arith.mulf %39, %41 : vector<16x32xf32>
      %c0_25 = arith.constant 0 : index
      %c0_26 = arith.constant 0 : index
      %43 = vector.load %arg6[%c0_25, %c0_26] : memref<1x32xf32, #tpu.memory_space<vmem>>, vector<1x32xf32>
      %44 = vector.broadcast %43 : vector<1x32xf32> to vector<16x32xf32>
      %45 = arith.addf %42, %44 : vector<16x32xf32>
      %c0_27 = arith.constant 0 : index
      %c0_28 = arith.constant 0 : index
      %46 = vector.load %arg10[%c0_27, %c0_28] : memref<16x32xf32, #tpu.memory_space<vmem>>, vector<16x32xf32>
      tpu.vector_store %arg10[%c0_27, %c0_28], %45 {strides = array<i32>} : memref<16x32xf32, #tpu.memory_space<vmem>>, vector<16x32xf32>,
    } else {
    }
    %c0 = arith.constant 0 : index
    %c0_1 = arith.constant 0 : index
    %3 = vector.load %arg10[%c0, %c0_1] : memref<16x32xf32, #tpu.memory_space<vmem>>, vector<16x32xf32>
    %c0_2 = arith.constant 0 : index
    %c0_3 = arith.constant 0 : index
    %4 = vector.load %arg7[%c0_2, %c0_3] : memref<128x32xf32, #tpu.memory_space<vmem>>, vector<128x32xf32>
    %cst = arith.constant dense<0.000000e+00> : vector<16x128xf32>
    %5 = tpu.matmul %3, %4, %cst {dimension_numbers = #tpu.dot_dimension_numbers<[1], [1], [0], [0], [0, 0, 1, 0], [], []>} : vector<16x32xf32>, vector<128x32xf32>, vector<16x128xf32> -> vector<16x128xf32>
    %c0_4 = arith.constant 0 : index
    %c0_5 = arith.constant 0 : index
    %6 = vector.load %arg8[%c0_4, %c0_5] : memref<1x128xf32, #tpu.memory_space<vmem>>, vector<1x128xf32>
    %7 = vector.broadcast %6 : vector<1x128xf32> to vector<16x128xf32>
    %8 = arith.addf %5, %7 : vector<16x128xf32>
    %c0_6 = arith.constant 0 : index
    %c0_7 = arith.constant 0 : index
    %9 = vector.load %arg9[%c0_6, %c0_7] : memref<16x128xf32, #tpu.memory_space<vmem>>, vector<16x128xf32>
    tpu.vector_store %arg9[%c0_6, %c0_7], %8 {strides = array<i32>} : memref<16x128xf32, #tpu.memory_space<vmem>>, vector<16x128xf32>,
    return
  }
  func.func @transform_0(%arg0: i32, %arg1: i32) -> (i32, i32) {
    %c0_i32 = arith.constant 0 : i32
    %c0_i32_0 = arith.constant 0 : i32
    return %arg0, %c0_i32 : i32, i32
  }
  func.func @transform_1(%arg0: i32, %arg1: i32) -> (i32, i32) {
    %c0_i32 = arith.constant 0 : i32
    %c0_i32_0 = arith.constant 0 : i32
    %c0_i32_1 = arith.constant 0 : i32
    return %c0_i32, %c0_i32_0 : i32, i32
  }
  func.func @transform_2(%arg0: i32, %arg1: i32) -> (i32, i32) {
    %c0_i32 = arith.constant 0 : i32
    %c0_i32_0 = arith.constant 0 : i32
    %c0_i32_1 = arith.constant 0 : i32
    return %c0_i32, %c0_i32_0 : i32, i32
  }
  func.func @transform_3(%arg0: i32, %arg1: i32) -> (i32, i32) {
    %c0_i32 = arith.constant 0 : i32
    %c0_i32_0 = arith.constant 0 : i32
    %c0_i32_1 = arith.constant 0 : i32
    return %c0_i32, %c0_i32_0 : i32, i32
  }
  func.func @transform_4(%arg0: i32, %arg1: i32) -> (i32, i32) {
    %c0_i32 = arith.constant 0 : i32
    %c0_i32_0 = arith.constant 0 : i32
    %c0_i32_1 = arith.constant 0 : i32
    return %c0_i32, %c0_i32_0 : i32, i32
  }
  func.func @transform_5(%arg0: i32, %arg1: i32) -> (i32, i32) {
    %c0_i32 = arith.constant 0 : i32
    %c0_i32_0 = arith.constant 0 : i32
    return %arg1, %c0_i32 : i32, i32
  }
  func.func @transform_6(%arg0: i32, %arg1: i32) -> (i32, i32) {
    %c0_i32 = arith.constant 0 : i32
    %c0_i32_0 = arith.constant 0 : i32
    return %c0_i32, %arg1 : i32, i32
  }
  func.func @transform_7(%arg0: i32, %arg1: i32) -> (i32, i32) {
    %c0_i32 = arith.constant 0 : i32
    return %arg0, %arg1 : i32, i32
  }
}

</mosaic_0001>

<bundles_post_ra>
// kernel: bert_only_mlm_head.1
= control target key start
LH: loop header
LB: loop body
LE: loop exit
PB: predicated region body
PF: predicated region fallthrough
CT: control target
= control target key end

     0   :  { %vm43_vm0 = vcmask 261120   ;;  %s701_s1 = inlined_call_operand.vmem [shape: f32[32,32], index: 1, kind: input, shape index: {}]   ;;  %s702_s0 = inlined_call_operand.vmem [shape: f32[16,32], index: 0, kind: input, shape index: {}]   ;;  %s703_s2 = inlined_call_operand.vmem [shape: f32[1,32], index: 2, kind: input, shape index: {}]   ;;  %s704_s5 = inlined_call_operand.vmem [shape: f32[128,32], index: 5, kind: input, shape index: {}]   ;;  %s705_s3 = inlined_call_operand.vmem [shape: f32[1,32], index: 3, kind: input, shape index: {}]   ;;  %s706_s4 = inlined_call_operand.vmem [shape: f32[1,32], index: 4, kind: input, shape index: {}]   ;;  %s707_s6 = inlined_call_operand.vmem [shape: f32[1,128], index: 6, kind: input, shape index: {}]   ;;  %s708_s7 = inlined_call_operand.vmem [shape: f32[16,128], index: 7, kind: output, shape index: {}]  }
   0x1   :  { %v32_v0 = vld [vmem:[%s701_s1] sm:$0xff]  ;;  %v33_v1 = vld [vmem:[%s701_s1 + $0x8] sm:$0xff]  ;;  %vm569_vm1 = vmpackc.low %vm43_vm0, %vm43_vm0 }
   0x2   :  { %v453_v3 = vpack.c.bf16 %v33_v1, %v32_v0  ;;  %v34_v4 = vld [vmem:[%s701_s1 + $0x10] sm:$0xff]  ;;  %v35_v5 = vld [vmem:[%s701_s1 + $0x18] sm:$0xff]  ;;  %v30_v6 = vld [vmem:[%s702_s0] sm:$0xff] }
   0x3   :  { %v459_v7 = vpack.c.bf16 %v35_v5, %v34_v4  ;;  %415 = vmatprep.mubr.msk.f32.mxu0 %vm43_vm0, %v30_v6  ;;  %v31_v8 = vld [vmem:[%s702_s0 + $0x8] sm:$0xff]  ;;  %v355_v9 = vld [vmem:[%s703_s2] ss:$0 sm:$0xff]  ;;  %v198_v28 = vld [vmem:[%s704_s5 + $0x10] sm:$0xff] }
   0x4   :  { %455 = vmatprep.subr.msk.bf16.mxu0 %vm569_vm1, %v453_v3  ;;  %v196_v26 = vld [vmem:[%s704_s5] sm:$0xff]  ;;  %v197_v27 = vld [vmem:[%s704_s5 + $0x8] sm:$0xff]  ;;  %v199_v30 = vld [vmem:[%s704_s5 + $0x18] sm:$0xff] }
   0x5   :  { %458 = vmatpush3.bf16.xpose.msk.msra.mxu0 %vm569_vm1, %v453_v3  ;;  %v465_v29 = vpack.c.bf16 %v197_v27, %v196_v26  ;;  %v471_v31 = vpack.c.bf16 %v199_v30, %v198_v28  ;;  %v200_v32 = vld [vmem:[%s704_s5 + $0x20] sm:$0xff]  ;;  %v201_v33 = vld [vmem:[%s704_s5 + $0x28] sm:$0xff]  ;;  %v202_v35 = vld [vmem:[%s704_s5 + $0x30] sm:$0xff] }
   0x6   :  { %461 = vmatprep.subr.msk.bf16.mxu0 %vm569_vm1, %v459_v7  ;;  %v477_v34 = vpack.c.bf16 %v201_v33, %v200_v32  ;;  %v203_v36 = vld [vmem:[%s704_s5 + $0x38] sm:$0xff]  ;;  %v204_v48 = vld [vmem:[%s704_s5 + $0x40] sm:$0xff]  ;;  %v205_v49 = vld [vmem:[%s704_s5 + $0x48] sm:$0xff] }
   0x7   :  { %467 = vmatprep.subr.msk.bf16.mxu1 %vm569_vm1, %v465_v29  ;;  %v483_v37 = vpack.c.bf16 %v203_v36, %v202_v35  ;;  %v489_v50 = vpack.c.bf16 %v205_v49, %v204_v48  ;;  %v206_v51 = vld [vmem:[%s704_s5 + $0x50] sm:$0xff]  ;;  %v207_v52 = vld [vmem:[%s704_s5 + $0x58] sm:$0xff]  ;;  %v208_v54 = vld [vmem:[%s704_s5 + $0x60] sm:$0xff] }
   0x8   :  { %470 = vmatpush3.bf16.xpose.msk.msra.mxu1 %vm569_vm1, %v465_v29  ;;  %v495_v53 = vpack.c.bf16 %v207_v52, %v206_v51  ;;  %v209_v55 = vld [vmem:[%s704_s5 + $0x68] sm:$0xff]  ;;  %v210_v57 = vld [vmem:[%s704_s5 + $0x70] sm:$0xff]  ;;  %v211_v58 = vld [vmem:[%s704_s5 + $0x78] sm:$0xff] }
   0x9   :  { %473 = vmatprep.subr.msk.bf16.mxu1 %vm569_vm1, %v471_v31  ;;  %v501_v56 = vpack.c.bf16 %v209_v55, %v208_v54  ;;  %v507_v59 = vpack.c.bf16 %v211_v58, %v210_v57  ;;  %v362_v4 = vld [vmem:[%s705_s3] ss:$0 sm:$0xff] }
   0xa   :  { %v363_v6 = vld [vmem:[%s706_s4] ss:$0 sm:$0xff] }
   0xd   :  { %464 = vmatpush3.bf16.xpose.msk.msra.mxu0 %vm569_vm1, %v459_v7 }
  0x10   :  { %476 = vmatpush3.bf16.xpose.msk.msra.mxu1 %vm569_vm1, %v471_v31 }
  0x11   :  { %479 = vmatprep.subr.msk.bf16.mxu1 %vm569_vm1, %v477_v34 }
  0x14   :  { %416 = vmatmul.mubr.msk.f32.vlgmr.msra.gmra.mrb[0].mxu0 %vm43_vm0, %v31_v8 }
  0x18   :  { %482 = vmatpush3.bf16.xpose.msk.msra.mxu1 %vm569_vm1, %v477_v34 }
  0x19   :  { %485 = vmatprep.subr.msk.bf16.mxu1 %vm569_vm1, %v483_v37 }
  0x20   :  { %488 = vmatpush3.bf16.xpose.msk.msra.mxu1 %vm569_vm1, %v483_v37 }
  0x21   :  { %491 = vmatprep.subr.msk.bf16.mxu1 %vm569_vm1, %v489_v50 }
  0x28   :  { %494 = vmatpush3.bf16.xpose.msk.msra.mxu1 %vm569_vm1, %v489_v50 }
  0x29   :  { %497 = vmatprep.subr.msk.bf16.mxu1 %vm569_vm1, %v495_v53 }
  0x30   :  { %500 = vmatpush3.bf16.xpose.msk.msra.mxu1 %vm569_vm1, %v495_v53 }
  0x31   :  { %503 = vmatprep.subr.msk.bf16.mxu1 %vm569_vm1, %v501_v56 }
  0x38   :  { %506 = vmatpush3.bf16.xpose.msk.msra.mxu1 %vm569_vm1, %v501_v56 }
  0x39   :  { %509 = vmatprep.subr.msk.bf16.mxu1 %vm569_vm1, %v507_v59 }
  0x40   :  { %512 = vmatpush3.bf16.xpose.msk.msra.mxu1 %vm569_vm1, %v507_v59 }
  0xe7   :  { %v417_v10 = vpop.f32.mrb[0].mxu0 }
  0xe8   :  { %v134_v11 = vadd.f32 %v417_v10, %v355_v9  ;;  %v128_v12 = vpop.f32.mrb[1].mxu0 }
  0xe9   :  { %v129_v13 = vadd.f32 %v355_v9, %v128_v12 }
  0xea   :  { %v140_v14 = vmul.f32 0.70710677, %v134_v11  ;;  %v138_v21 = vmul.f32 0.5, %v134_v11 }
  0xeb   :  { %v139_v15 = vmul.f32 0.70710677, %v129_v13  ;;  %v137_v18 = vmul.f32 0.5, %v129_v13 }
  0xec   :  { %513 = verf.f32 %v140_v14  ;;  %v364_v14 = vld [vmem:[%s707_s6] ss:$0 sm:$0xff] }
  0xed   :  { %515 = verf.f32 %v139_v15 }
  0xf6   :  { %v514_v16 = vpop.eup %513 }
  0xf7   :  { %v516_v17 = vpop.eup %515  ;;  %v144_v20 = vadd.f32 1.0, %v514_v16 }
  0xf8   :  { %v143_v19 = vadd.f32 1.0, %v516_v17 }
  0xf9   :  { %v146_v24 = vmul.f32 %v144_v20, %v138_v21 }
  0xfa   :  { %v145_v22 = vmul.f32 %v143_v19, %v137_v18 }
  0xfb   :  { %v150_v25 = vsel %vm43_vm0, %v146_v24, 0.0 }
  0xfc   :  { %v147_v23 = vsel %vm43_vm0, %v145_v22, 0.0 }
  0xfd   :  { %148 = vadd.xlane.f32.xlu0 %v147_v23 }
 0x101   :  { %151 = vadd.xlane.f32.xlu0 %v150_v25 }
 0x18a   :  { %v149_v38 = vpop.xlane.xlu0 %148 }
 0x18b   :  { %v154_v39 = vmul.f32 0.03125, %v149_v38 }
 0x18d   :  { %v156_v40 = vsub.f32 %v145_v22, %v154_v39 }
 0x18e   :  { %v152_v41 = vpop.xlane.xlu0 %151 }
 0x18f   :  { %v155_v42 = vmul.f32 0.03125, %v152_v41  ;;  %v158_v43 = vmul.f32 %v156_v40, %v156_v40 }
 0x191   :  { %v157_v44 = vsub.f32 %v146_v24, %v155_v42  ;;  %v160_v45 = vsel %vm43_vm0, %v158_v43, 0.0 }
 0x192   :  { %161 = vadd.xlane.f32.xlu1 %v160_v45 }
 0x193   :  { %v159_v46 = vmul.f32 %v157_v44, %v157_v44 }
 0x195   :  { %v163_v47 = vsel %vm43_vm0, %v159_v46, 0.0 }
 0x196   :  { %164 = vadd.xlane.f32.xlu1 %v163_v47 }
 0x21f   :  { %v162_v60 = vpop.xlane.xlu1 %161 }
 0x220   :  { %v166_v61 = vmul.f32 0.03125, %v162_v60 }
 0x222   :  { %v168_v62 = vadd.f32 1e-12, %v166_v61 }
 0x223   :  { %v165_v63 = vpop.xlane.xlu1 %164 }
 0x224   :  { %517 = vrsqrt.f32 %v168_v62  ;;  %v167_v0 = vmul.f32 0.03125, %v165_v63 }
 0x226   :  { %v169_v1 = vadd.f32 1e-12, %v167_v0 }
 0x228   :  { %519 = vrsqrt.f32 %v169_v1 }
 0x22e   :  { %v518_v3 = vpop.eup %517 }
 0x22f   :  { %v172_v5 = vmul.f32 %v518_v3, %v156_v40 }
 0x231   :  { %v181_v2 = vmul.f32 %v362_v4, %v172_v5 }
 0x232   :  { %v520_v7 = vpop.eup %519 }
 0x233   :  { %v190_v8 = vadd.f32 %v363_v6, %v181_v2  ;;  %v173_v9 = vmul.f32 %v520_v7, %v157_v44 }
 0x235   :  { %192 = vst.msk [vmem:[#allocation2] sm:$0xff] %vm43_vm0, %v190_v8  ;;  %v182_v10 = vmul.f32 %v362_v4, %v173_v9 }
 0x237   :  { %v191_v11 = vadd.f32 %v363_v6, %v182_v10 }
 0x239   :  { %193 = vst.msk [vmem:[#allocation2 + $0x8] sm:$0xff] %vm43_vm0, %v191_v11 }
 0x23c   :  { %v194_v12 = vld [vmem:[#allocation2] sm:$0xff] }
 0x23d   :  { %450 = vmatprep.mubr.msk.f32.mxu1 %vm43_vm0, %v194_v12 }
 0x240   :  { %v195_v13 = vld [vmem:[#allocation2 + $0x8] sm:$0xff] }
 0x241   :  { %451 = vmatmul.mubr.msk.f32.vlgmr.msra.gmra.mrb[0].mxu1 %vm43_vm0, %v195_v13 }
 0x314   :  { %v452_v15 = vpop.f32.mrb[0].mxu1 }
 0x315   :  { %v346_v16 = vadd.f32 %v452_v15, %v364_v14  ;;  %v340_v17 = vpop.f32.mrb[1].mxu1 }
 0x316   :  { %v341_v18 = vadd.f32 %v364_v14, %v340_v17 }
 0x317   :  { %350 = vst [vmem:[%s708_s7 + $0x8] sm:$0xff] %v346_v16 }
 0x318   :  { %349 = vst [vmem:[%s708_s7] sm:$0xff] %v341_v18 }

</bundles_post_ra>
